<compile_context>
chip_gen: v5e
topology: v5e:2x2
jax: 0.10.0
libtpu: 0.0.40
codegen_flags: <defaults>
</compile_context>

<pallas_src>
import jax
import jax.numpy as jnp
from jax.experimental import pallas as pl
from jax.experimental.pallas import tpu as pltpu

_LANES = 128


def _dense_square_kernel(w_sm, b_sm, x_ref, o_ref):
    """VPU-only dense + square on a channel-major 3-D block.

    w_sm : SMEM [K*M]   (row-major flatten of w[K, M])
    b_sm : SMEM [M]
    x_ref: VMEM [K, t_rows, 128]
    o_ref: VMEM [M, t_rows, 128]
    """
    k_dim = x_ref.shape[0]
    m_dim = o_ref.shape[0]

    # Load each K-slice of x once (K is tiny and static).
    xs = [x_ref[k] for k in range(k_dim)]            # each [t_rows, 128]

    for m in range(m_dim):                            # static unroll, M = 3
        # y = sum_k w[k, m] * x[k] + b[m]   (scalar * vector FMAs, f32 acc)
        y = xs[0] * w_sm[m] + b_sm[m]
        for k in range(1, k_dim):
            y = y + xs[k] * w_sm[k * m_dim + m]
        o_ref[m] = (y * y).astype(o_ref.dtype)        # lane-dense full-vreg store


def dense_square(x, w, b, *, t_rows=256):
    """Computes (x @ w + b) ** 2 with a lane/sublane-dense VPU Pallas kernel."""
    N, K = x.shape
    K2, M = w.shape
    assert K == K2 and b.shape == (M,)
    out_dtype = x.dtype

    # ---- layout plumbing (wrapper side) -------------------------------------
    xT = x.T                                          # [K, N]  channel-major

    r_total = pl.cdiv(N, _LANES)                      # 128-lane rows needed
    t_rows = max(1, min(t_rows, r_total))
    if t_rows < r_total:
        # Multi-block path: keep the second-minor block dim a multiple of 8.
        t_rows = max(8, (t_rows // 8) * 8)
    n_blocks = pl.cdiv(r_total, t_rows)
    r_pad = n_blocks * t_rows
    n_pad = r_pad * _LANES

    if n_pad != N:
        xT = jnp.pad(xT, ((0, 0), (0, n_pad - N)))    # pad batch (zeros)
    x3 = xT.reshape(K, r_pad, _LANES)                 # free minor-dim split

    w_flat = w.reshape(K * M).astype(jnp.float32)     # SMEM scalars
    b_flat = b.reshape(M).astype(jnp.float32)

    itemsize = jnp.dtype(x.dtype).itemsize
    cost = pl.CostEstimate(
        flops=int(M * n_pad * (2 * K + 1)),
        transcendentals=0,
        bytes_accessed=int((K + M) * n_pad * itemsize + (K * M + M) * 4),
    )

    o3 = pl.pallas_call(
        _dense_square_kernel,
        out_shape=jax.ShapeDtypeStruct((M, r_pad, _LANES), out_dtype),
        grid=(n_blocks,),
        in_specs=[
            pl.BlockSpec(memory_space=pltpu.MemorySpace.SMEM),        # w_flat
            pl.BlockSpec(memory_space=pltpu.MemorySpace.SMEM),        # b_flat
            pl.BlockSpec((K, t_rows, _LANES), lambda i: (0, i, 0)),   # x3
        ],
        out_specs=pl.BlockSpec((M, t_rows, _LANES), lambda i: (0, i, 0)),
        compiler_params=pltpu.CompilerParams(
            dimension_semantics=("parallel",)),
        cost_estimate=cost,
    )(w_flat, b_flat, x3)

    # Back to module layout [N, M]; drop batch padding.
    return o3.reshape(M, n_pad)[:, :N].T


if __name__ == "__main__":
    key = jax.random.PRNGKey(0)
    kx, kw, kb = jax.random.split(key, 3)

    K, M = 2, 3
    w = jax.random.normal(kw, (K, M), dtype=jnp.float32)
    b = jax.random.normal(kb, (M,), dtype=jnp.float32)

    def ref_fn(xx):
        return (xx @ w + b) ** 2

    # Case 1: tiny batch -> single block (block dims == full array dims).
    x_small = jax.random.normal(kx, (8, K), dtype=jnp.float32)
    out_small = jax.block_until_ready(dense_square(x_small, w, b))
    assert out_small.shape == (8, M)
    assert jnp.allclose(out_small, ref_fn(x_small), atol=1e-5, rtol=1e-5), \
        "mismatch vs reference (single-block path)"

    # Case 2: ragged batch (2085) -> exercises padding + multi-block parallel grid.
    x_big = jax.random.normal(kx, (2085, K), dtype=jnp.float32)
    out_big = jax.block_until_ready(dense_square(x_big, w, b, t_rows=8))
    assert out_big.shape == (2085, M)
    assert jnp.allclose(out_big, ref_fn(x_big), atol=1e-5, rtol=1e-5), \
        "mismatch vs reference (tiled path)"

    print("KERNEL_OK")
</pallas_src>

<mosaic_0001>
module attributes {stable_mosaic.version = 11 : i64} {
  func.func @_dense_square_kernel(%arg0: i32, %arg1: memref<6xf32, #tpu.memory_space<smem>>, %arg2: memref<3xf32, #tpu.memory_space<smem>>, %arg3: memref<2x1x128xf32, #tpu.memory_space<vmem>>, %arg4: memref<3x1x128xf32, #tpu.memory_space<vmem>>) attributes {dimension_semantics = [#tpu.dimension_semantics<parallel>], iteration_bounds = array<i64: 1>, scalar_prefetch = 0 : i64, scratch_operands = 0 : i64, tpu.core_type = #tpu.core_type<tc>, window_params = [{transform_indices = @transform_0, window_bounds = array<i64: 6>}, {transform_indices = @transform_1, window_bounds = array<i64: 3>}, {transform_indices = @transform_2, window_bounds = array<i64: 2, 1, 128>}, {transform_indices = @transform_3, window_bounds = array<i64: 3, 1, 128>}]} {
    %c0 = arith.constant 0 : index
    %c0_0 = arith.constant 0 : index
    %c0_1 = arith.constant 0 : index
    %0 = vector.load %arg3[%c0, %c0_0, %c0_1] : memref<2x1x128xf32, #tpu.memory_space<vmem>>, vector<1x1x128xf32>
    %1 = vector.shape_cast %0 : vector<1x1x128xf32> to vector<1x128xf32>
    %c1 = arith.constant 1 : index
    %c0_2 = arith.constant 0 : index
    %c0_3 = arith.constant 0 : index
    %2 = vector.load %arg3[%c1, %c0_2, %c0_3] : memref<2x1x128xf32, #tpu.memory_space<vmem>>, vector<1x1x128xf32>
    %3 = vector.shape_cast %2 : vector<1x1x128xf32> to vector<1x128xf32>
    %c0_4 = arith.constant 0 : index
    %4 = memref.load %arg1[%c0_4] : memref<6xf32, #tpu.memory_space<smem>>
    %5 = vector.broadcast %4 : f32 to vector<1x128xf32>
    %6 = arith.mulf %1, %5 : vector<1x128xf32>
    %c0_5 = arith.constant 0 : index
    %7 = memref.load %arg2[%c0_5] : memref<3xf32, #tpu.memory_space<smem>>
    %8 = vector.broadcast %7 : f32 to vector<1x128xf32>
    %9 = arith.addf %6, %8 : vector<1x128xf32>
    %c3 = arith.constant 3 : index
    %10 = memref.load %arg1[%c3] : memref<6xf32, #tpu.memory_space<smem>>
    %11 = vector.broadcast %10 : f32 to vector<1x128xf32>
    %12 = arith.mulf %3, %11 : vector<1x128xf32>
    %13 = arith.addf %9, %12 : vector<1x128xf32>
    %14 = arith.mulf %13, %13 : vector<1x128xf32>
    %c0_6 = arith.constant 0 : index
    %c0_7 = arith.constant 0 : index
    %c0_8 = arith.constant 0 : index
    %15 = vector.load %arg4[%c0_6, %c0_7, %c0_8] : memref<3x1x128xf32, #tpu.memory_space<vmem>>, vector<1x1x128xf32>
    %16 = vector.shape_cast %15 : vector<1x1x128xf32> to vector<1x128xf32>
    %17 = vector.shape_cast %14 : vector<1x128xf32> to vector<1x1x128xf32>
    tpu.vector_store %arg4[%c0_6, %c0_7, %c0_8], %17 {strides = array<i32>} : memref<3x1x128xf32, #tpu.memory_space<vmem>>, vector<1x1x128xf32>,
    %c1_9 = arith.constant 1 : index
    %18 = memref.load %arg1[%c1_9] : memref<6xf32, #tpu.memory_space<smem>>
    %19 = vector.broadcast %18 : f32 to vector<1x128xf32>
    %20 = arith.mulf %1, %19 : vector<1x128xf32>
    %c1_10 = arith.constant 1 : index
    %21 = memref.load %arg2[%c1_10] : memref<3xf32, #tpu.memory_space<smem>>
    %22 = vector.broadcast %21 : f32 to vector<1x128xf32>
    %23 = arith.addf %20, %22 : vector<1x128xf32>
    %c4 = arith.constant 4 : index
    %24 = memref.load %arg1[%c4] : memref<6xf32, #tpu.memory_space<smem>>
    %25 = vector.broadcast %24 : f32 to vector<1x128xf32>
    %26 = arith.mulf %3, %25 : vector<1x128xf32>
    %27 = arith.addf %23, %26 : vector<1x128xf32>
    %28 = arith.mulf %27, %27 : vector<1x128xf32>
    %c1_11 = arith.constant 1 : index
    %c0_12 = arith.constant 0 : index
    %c0_13 = arith.constant 0 : index
    %29 = vector.load %arg4[%c1_11, %c0_12, %c0_13] : memref<3x1x128xf32, #tpu.memory_space<vmem>>, vector<1x1x128xf32>
    %30 = vector.shape_cast %29 : vector<1x1x128xf32> to vector<1x128xf32>
    %31 = vector.shape_cast %28 : vector<1x128xf32> to vector<1x1x128xf32>
    tpu.vector_store %arg4[%c1_11, %c0_12, %c0_13], %31 {strides = array<i32>} : memref<3x1x128xf32, #tpu.memory_space<vmem>>, vector<1x1x128xf32>,
    %c2 = arith.constant 2 : index
    %32 = memref.load %arg1[%c2] : memref<6xf32, #tpu.memory_space<smem>>
    %33 = vector.broadcast %32 : f32 to vector<1x128xf32>
    %34 = arith.mulf %1, %33 : vector<1x128xf32>
    %c2_14 = arith.constant 2 : index
    %35 = memref.load %arg2[%c2_14] : memref<3xf32, #tpu.memory_space<smem>>
    %36 = vector.broadcast %35 : f32 to vector<1x128xf32>
    %37 = arith.addf %34, %36 : vector<1x128xf32>
    %c5 = arith.constant 5 : index
    %38 = memref.load %arg1[%c5] : memref<6xf32, #tpu.memory_space<smem>>
    %39 = vector.broadcast %38 : f32 to vector<1x128xf32>
    %40 = arith.mulf %3, %39 : vector<1x128xf32>
    %41 = arith.addf %37, %40 : vector<1x128xf32>
    %42 = arith.mulf %41, %41 : vector<1x128xf32>
    %c2_15 = arith.constant 2 : index
    %c0_16 = arith.constant 0 : index
    %c0_17 = arith.constant 0 : index
    %43 = vector.load %arg4[%c2_15, %c0_16, %c0_17] : memref<3x1x128xf32, #tpu.memory_space<vmem>>, vector<1x1x128xf32>
    %44 = vector.shape_cast %43 : vector<1x1x128xf32> to vector<1x128xf32>
    %45 = vector.shape_cast %42 : vector<1x128xf32> to vector<1x1x128xf32>
    tpu.vector_store %arg4[%c2_15, %c0_16, %c0_17], %45 {strides = array<i32>} : memref<3x1x128xf32, #tpu.memory_space<vmem>>, vector<1x1x128xf32>,
    return
  }
  func.func @transform_0(%arg0: i32) -> i32 {
    %c0_i32 = arith.constant 0 : i32
    %c0_i32_0 = arith.constant 0 : i32
    return %c0_i32 : i32
  }
  func.func @transform_1(%arg0: i32) -> i32 {
    %c0_i32 = arith.constant 0 : i32
    %c0_i32_0 = arith.constant 0 : i32
    return %c0_i32 : i32
  }
  func.func @transform_2(%arg0: i32) -> (i32, i32, i32) {
    %c0_i32 = arith.constant 0 : i32
    %c0_i32_0 = arith.constant 0 : i32
    %c0_i32_1 = arith.constant 0 : i32
    return %c0_i32, %arg0, %c0_i32_0 : i32, i32, i32
  }
  func.func @transform_3(%arg0: i32) -> (i32, i32, i32) {
    %c0_i32 = arith.constant 0 : i32
    %c0_i32_0 = arith.constant 0 : i32
    %c0_i32_1 = arith.constant 0 : i32
    return %c0_i32, %arg0, %c0_i32_0 : i32, i32, i32
  }
}

</mosaic_0001>

<bundles_post_ra>
// kernel: tpu_custom_call.1
= control target key start
LH: loop header
LB: loop body
LE: loop exit
PB: predicated region body
PF: predicated region fallthrough
CT: control target
= control target key end

     0   :  { %8 = vsyncpa [#allocation5], 0  ;;  %s255_s0 = inlined_call_operand.hbm [shape: f32[6], index: 0, kind: input, shape index: {}]   ;;  %s256_s1 = inlined_call_operand.hbm [shape: f32[3], index: 1, kind: input, shape index: {}]   ;;  %s257_s2 = inlined_call_operand.hbm [shape: f32[2,1,128], index: 2, kind: input, shape index: {}]   ;;  %s258_s3 = inlined_call_operand.hbm [shape: f32[3,1,128], index: 3, kind: output, shape index: {}]  }
   0x1   :  { %9 = vsyncpa [#allocation7], 0 }
   0x2   :  { %10 = vsyncpa [#allocation3], 0 }
   0x3   :  { %11 = vsyncpa [#allocation4], 0  ;;  %s17_s14 = sshll.u32 %s255_s0, 4  ;;  %s26_s17 = sshll.u32 %s256_s1, 4  ;;  %s18_s14 = int_to_ptr.hbm [resolvable:$true] %s17_s14  ;;  %s27_s17 = int_to_ptr.hbm [resolvable:$true] %s26_s17 }
   0x4   :  { %s211_s18 = smov [#allocation2]   ;;  %s212_s19 = smov [#allocation6]  }
   0x5   :  { %20 = dma.hbm_to_smem %s18_s14, 16, %s211_s18, [#allocation5]  }
   0x6   :  { %29 = dma.hbm_to_smem %s27_s17, 16, %s212_s19, [#allocation7]  }
   0x7   :  { %s34_s22 = sshll.u32 %s257_s2, 4  ;;  %s213_s23 = smov [#allocation8]   ;;  %s35_s22 = int_to_ptr.hbm [resolvable:$true] %s34_s22 }
   0x8   :  { %s36_s24 = sshll.u32 %s213_s23, 4  ;;  %s214_s25 = smov 16   ;;  %s37_s24 = int_to_ptr.vmem [resolvable:$true] %s36_s24 }
   0x9   :  { %s215_s0 = smov 1  }
   0xa   :  { %42 = dma.hbm_to_vmem [thread:$0]  %s35_s22, 32, %s37_s24, [#allocation3], %s214_s25, %s214_s25, %s215_s0  }
   0xb   :  { %203 = dma.done.wait [#allocation5], 16  }
   0xc   :  { %204 = vsyncadd [#allocation5], 4294967280 }
   0xd   :  { %205 = dma.done.wait [#allocation7], 16  }
   0xe   :  { %206 = vsyncadd [#allocation7], 4294967280 }
   0xf   :  { %207 = dma.done.wait [#allocation3], 32  }
  0x10   :  { %208 = vsyncadd [#allocation3], 4294967264 }
  0x11   :  { %55 = sfence }
  0x12   :  { %s59_s1 = sld [smem:[#allocation2]]  ;;  %v56_v0 = vld [vmem:[#allocation8] sm:$0x1]  ;;  %v58_v1 = vld [vmem:[#allocation8 + $0x1] sm:$0x1]  ;;  %s216_s6 = smov [#allocation9]  }
  0x13   :  { %s62_s26 = sld [smem:[#allocation6]]  ;;  %s101_s7 = sshll.u32 %s216_s6, 4  ;;  %s102_s7 = int_to_ptr.vmem [resolvable:$true] %s101_s7 }
  0x14   :  { %s118_s2 = sld [smem:[#allocation2 + $0x3]]  ;;  %s103_s10 = sshll.u32 %s258_s3, 4  ;;  %s104_s10 = int_to_ptr.hbm [resolvable:$true] %s103_s10 }
  0x15   :  { %s119_s27 = sld [smem:[#allocation2 + $0x1]] }
  0x16   :  { %s120_s28 = sld [smem:[#allocation6 + $0x1]] }
  0x17   :  { %s121_s29 = sld [smem:[#allocation2 + $0x4]] }
  0x18   :  { %v60_v2 = vstv %s59_s1  ;;  %s122_s30 = sld [smem:[#allocation2 + $0x2]] }
  0x19   :  { %v61_v3 = vmul.f32 %v60_v2, %v56_v0  ;;  %v63_v4 = vstv %s62_s26  ;;  %s123_s4 = sld [smem:[#allocation6 + $0x2]] }
  0x1a   :  { %v66_v5 = vstv %s118_s2  ;;  %s124_s5 = sld [smem:[#allocation2 + $0x5]] }
  0x1b   :  { %v64_v6 = vadd.f32 %v63_v4, %v61_v3  ;;  %v67_v7 = vmul.f32 %v66_v5, %v58_v1  ;;  %v72_v8 = vstv %s119_s27 }
  0x1c   :  { %v73_v9 = vmul.f32 %v72_v8, %v56_v0  ;;  %v75_v10 = vstv %s120_s28 }
  0x1d   :  { %v68_v11 = vadd.f32 %v67_v7, %v64_v6  ;;  %v78_v12 = vstv %s121_s29 }
  0x1e   :  { %v76_v13 = vadd.f32 %v75_v10, %v73_v9  ;;  %v79_v14 = vmul.f32 %v78_v12, %v58_v1  ;;  %v85_v15 = vstv %s122_s30 }
  0x1f   :  { %v69_v16 = vmul.f32 %v68_v11, %v68_v11  ;;  %v86_v17 = vmul.f32 %v85_v15, %v56_v0  ;;  %v88_v18 = vstv %s123_s4 }
  0x20   :  { %v80_v19 = vadd.f32 %v79_v14, %v76_v13  ;;  %v91_v20 = vstv %s124_s5 }
  0x21   :  { %70 = vst [vmem:[#allocation9] sm:$0x1] %v69_v16  ;;  %v89_v21 = vadd.f32 %v88_v18, %v86_v17  ;;  %v92_v22 = vmul.f32 %v91_v20, %v58_v1 }
  0x22   :  { %v81_v23 = vmul.f32 %v80_v19, %v80_v19 }
  0x23   :  { %v93_v24 = vadd.f32 %v92_v22, %v89_v21 }
  0x24   :  { %83 = vst [vmem:[#allocation9 + $0x1] sm:$0x1] %v81_v23 }
  0x25   :  { %v94_v25 = vmul.f32 %v93_v24, %v93_v24 }
  0x27   :  { %96 = vst [vmem:[#allocation9 + $0x2] sm:$0x1] %v94_v25 }
  0x28   :  { %109 = dma.vmem_to_hbm [thread:$0]  %s102_s7, 48, %s104_s10, [#allocation4], %s214_s25, %s214_s25, %s215_s0  }
  0x29   :  { %209 = dma.done.wait [#allocation4], 48  }
  0x2a   :  { %210 = vsyncadd [#allocation4], 4294967248 }
  0x2b   :  { %114 = vsyncpa [#allocation3], 1 }
  0x2c   :  { %115 = vsyncpa [#allocation4], 1 }
  0x2d   :  { %116 = vsyncpa [#allocation5], 1 }
  0x2e   :  { %117 = vsyncpa [#allocation7], 1 }

</bundles_post_ra>
